<compile_context>
chip_gen: v7x
topology: tpu7x:2x2x1
jax: 0.10.0
libtpu: 0.0.40
codegen_flags: <defaults>
</compile_context>

<pallas_src>
import jax
import jax.numpy as jnp
from jax.experimental import pallas as pl
from jax.experimental.pallas import tpu as pltpu

H1 = 512   # fc1 output features
H2 = 128   # fc2 output features


def _cdiv(a, b):
    return -(-a // b)


def _round_up(n, m):
    return ((n + m - 1) // m) * m


def _mlp_kernel(x_ref, w1_ref, b1_ref, w2_ref, b2_ref, w3p_ref, b3_ref, o_ref):
    # x_ref: (tb, K) f32; w*: bf16; b1/b2: (1,H) f32; b3: (1,1) f32 in SMEM.
    # o_ref: (8, tb) f32 -- row 0 is the real fc3/sigmoid output.
    x = x_ref[...].astype(jnp.bfloat16)                                   # MXU operand
    h1 = jnp.dot(x, w1_ref[...], preferred_element_type=jnp.float32)     # (tb, 512)
    h1 = jnp.maximum(h1 + b1_ref[...], 0.0)                              # relu (f32)
    h2 = jnp.dot(h1.astype(jnp.bfloat16), w2_ref[...],
                 preferred_element_type=jnp.float32)                     # (tb, 128)
    h2 = jnp.maximum(h2 + b2_ref[...], 0.0)                              # relu (f32)
    # fc3: contract (8,128) with (tb,128) along the 128-axis -> (8, tb).
    # Row 0 carries w3^T @ h2^T; rows 1..7 are zero padding (discarded outside).
    z = jax.lax.dot_general(
        w3p_ref[...], h2.astype(jnp.bfloat16),
        dimension_numbers=(((1,), (1,)), ((), ())),
        preferred_element_type=jnp.float32)                              # (8, tb)
    o_ref[...] = jax.nn.sigmoid(z + b3_ref[0, 0])                        # lane-dense store


def _compute_tiling(B, tile_b):
    """Balanced batch tiling: pad waste < 128 rows/tile, tb lane-dense for B>=128."""
    num_tiles = max(1, _cdiv(B, tile_b))
    # v7x has 2 TensorCores; a single-step grid leaves one idle. Force >=2 steps
    # once the batch can be split into two 128-aligned tiles (no-op on v5e/v6e).
    if B >= 256 and num_tiles < 2:
        num_tiles = 2
    if B < 128:
        num_tiles = 1
        tb = _round_up(max(B, 1), 8)       # tiny batch: masked lane store, still correct
    else:
        tb = _round_up(_cdiv(B, num_tiles), 128)
    b_pad = num_tiles * tb
    return num_tiles, tb, b_pad


def net_forward(x, packed_params, *, tile_b=2048):
    """x: (B, 2*embedding_dim). Returns sigmoid(fc3(relu(fc2(relu(fc1(x)))))).squeeze()."""
    w1, b1, w2, b2, w3p, b3 = packed_params
    B, K = x.shape

    num_tiles, tb, b_pad = _compute_tiling(B, tile_b)
    if b_pad != B:
        x = jnp.pad(x, ((0, b_pad - B), (0, 0)))

    flops = 2 * b_pad * (K * H1 + H1 * H2 + H2 * 8)
    bytes_accessed = (x.size * x.dtype.itemsize
                      + sum(int(a.size) * a.dtype.itemsize for a in packed_params)
                      + 8 * b_pad * 4)

    out = pl.pallas_call(
        _mlp_kernel,
        out_shape=jax.ShapeDtypeStruct((8, b_pad), jnp.float32),
        grid=(num_tiles,),
        in_specs=[
            pl.BlockSpec((tb, K), lambda i: (i, 0)),            # x: streamed per tile
            pl.BlockSpec((K, H1), lambda i: (0, 0)),            # w1: DMA'd once, reused
            pl.BlockSpec((1, H1), lambda i: (0, 0)),            # b1
            pl.BlockSpec((H1, H2), lambda i: (0, 0)),           # w2
            pl.BlockSpec((1, H2), lambda i: (0, 0)),            # b2
            pl.BlockSpec((8, H2), lambda i: (0, 0)),            # w3^T zero-padded
            pl.BlockSpec(memory_space=pltpu.MemorySpace.SMEM),  # b3 scalar
        ],
        out_specs=pl.BlockSpec((8, tb), lambda i: (0, i)),
        compiler_params=pltpu.CompilerParams(
            dimension_semantics=("parallel",),
            vmem_limit_bytes=48 * 1024 * 1024),
        cost_estimate=pl.CostEstimate(
            flops=flops, transcendentals=8 * b_pad, bytes_accessed=bytes_accessed),
    )(x, w1, b1, w2, b2, w3p, b3)

    # Row 0 of the slab is the result; squeeze matches torch's .squeeze()
    # (shape (B,) for B>1, scalar for B==1).
    return jnp.squeeze(out[0, :B])


def init_params(key, embedding_dim):
    """PyTorch-like uniform init; weights as (in, out) f32, biases as (1, out) f32."""
    k = 2 * embedding_dim
    keys = jax.random.split(key, 6)

    def linear(kw, kb, fan_in, fan_out):
        bound = 1.0 / jnp.sqrt(fan_in)
        w = jax.random.uniform(kw, (fan_in, fan_out), jnp.float32, -bound, bound)
        b = jax.random.uniform(kb, (1, fan_out), jnp.float32, -bound, bound)
        return w, b

    w1, b1 = linear(keys[0], keys[1], k, H1)
    w2, b2 = linear(keys[2], keys[3], H1, H2)
    w3, b3 = linear(keys[4], keys[5], H2, 1)
    return (w1, b1, w2, b2, w3, b3)


def pack_params(params):
    """Kernel layout: bf16 MXU weights, f32 biases, w3^T zero-padded to (8,128)."""
    w1, b1, w2, b2, w3, b3 = params
    w3p = jnp.zeros((8, H2), jnp.float32).at[0, :].set(w3[:, 0])
    return (w1.astype(jnp.bfloat16), b1.astype(jnp.float32),
            w2.astype(jnp.bfloat16), b2.astype(jnp.float32),
            w3p.astype(jnp.bfloat16), b3.reshape(1, 1).astype(jnp.float32))


def net_forward_ref(x, params):
    """Pure-JAX f32 reference matching the PyTorch module."""
    w1, b1, w2, b2, w3, b3 = params
    h1 = jnp.maximum(x @ w1 + b1, 0.0)
    h2 = jnp.maximum(h1 @ w2 + b2, 0.0)
    return jnp.squeeze(jax.nn.sigmoid(h2 @ w3 + b3))


if __name__ == "__main__":
    embedding_dim = 32          # -> input feature dim 64

    key = jax.random.PRNGKey(0)
    k_x1, k_x2, k_p = jax.random.split(key, 3)
    params = init_params(k_p, embedding_dim)
    packed = pack_params(params)

    # 1) Small batch (single tiny tile, masked-store fallback path).
    batch_small = 8
    x_small = jax.random.normal(k_x1, (batch_small, 2 * embedding_dim), jnp.float32)
    y_small = net_forward(x_small, packed)
    jax.block_until_ready(y_small)
    assert y_small.shape == (batch_small,)
    assert bool(jnp.all((y_small > 0.0) & (y_small < 1.0)))
    y_small_ref = net_forward_ref(x_small, params)
    assert bool(jnp.allclose(y_small, y_small_ref, atol=2e-2, rtol=0.0)), \
        float(jnp.max(jnp.abs(y_small - y_small_ref)))

    # 2) Batch exercising the balanced multi-tile + padded lane-dense path
    #    (B=384 >= 256 -> num_tiles forced to 2, tb=256, b_pad=512).
    batch_big = 384
    x_big = jax.random.normal(k_x2, (batch_big, 2 * embedding_dim), jnp.float32)
    y_big = net_forward(x_big, packed)
    jax.block_until_ready(y_big)
    assert y_big.shape == (batch_big,)
    y_big_ref = net_forward_ref(x_big, params)
    assert bool(jnp.allclose(y_big, y_big_ref, atol=2e-2, rtol=0.0)), \
        float(jnp.max(jnp.abs(y_big - y_big_ref)))

    print("KERNEL_OK")
</pallas_src>

<mosaic_0001>
module attributes {stable_mosaic.version = 11 : i64} {
  func.func @_mlp_kernel(%arg0: i32, %arg1: memref<8x64xf32, #tpu.memory_space<vmem>>, %arg2: memref<64x512xbf16, #tpu.memory_space<vmem>>, %arg3: memref<1x512xf32, #tpu.memory_space<vmem>>, %arg4: memref<512x128xbf16, #tpu.memory_space<vmem>>, %arg5: memref<1x128xf32, #tpu.memory_space<vmem>>, %arg6: memref<8x128xbf16, #tpu.memory_space<vmem>>, %arg7: memref<1x1xf32, #tpu.memory_space<smem>>, %arg8: memref<8x8xf32, #tpu.memory_space<vmem>>) attributes {dimension_semantics = [#tpu.dimension_semantics<parallel>], iteration_bounds = array<i64: 1>, scalar_prefetch = 0 : i64, scratch_operands = 0 : i64, tpu.core_type = #tpu.core_type<tc>, window_params = [{transform_indices = @transform_0, window_bounds = array<i64: 8, 64>}, {pipeline_mode = #tpu.pipeline_mode<synchronous>, transform_indices = @transform_1, window_bounds = array<i64: 64, 512>}, {pipeline_mode = #tpu.pipeline_mode<synchronous>, transform_indices = @transform_2, window_bounds = array<i64: 1, 512>}, {pipeline_mode = #tpu.pipeline_mode<synchronous>, transform_indices = @transform_3, window_bounds = array<i64: 512, 128>}, {pipeline_mode = #tpu.pipeline_mode<synchronous>, transform_indices = @transform_4, window_bounds = array<i64: 1, 128>}, {pipeline_mode = #tpu.pipeline_mode<synchronous>, transform_indices = @transform_5, window_bounds = array<i64: 8, 128>}, {transform_indices = @transform_6, window_bounds = array<i64: 1, 1>}, {transform_indices = @transform_7, window_bounds = array<i64: 8, 8>}]} {
    %c0 = arith.constant 0 : index
    %c0_0 = arith.constant 0 : index
    %0 = vector.load %arg1[%c0, %c0_0] : memref<8x64xf32, #tpu.memory_space<vmem>>, vector<8x64xf32>
    %1 = arith.truncf %0 : vector<8x64xf32> to vector<8x64xbf16>
    %c0_1 = arith.constant 0 : index
    %c0_2 = arith.constant 0 : index
    %2 = vector.load %arg2[%c0_1, %c0_2] : memref<64x512xbf16, #tpu.memory_space<vmem>>, vector<64x512xbf16>
    %cst = arith.constant dense<0.000000e+00> : vector<8x512xf32>
    %3 = tpu.matmul %1, %2, %cst {dimension_numbers = #tpu.dot_dimension_numbers<[1], [0], [0], [1], [0, 0, 1, 1], [], []>} : vector<8x64xbf16>, vector<64x512xbf16>, vector<8x512xf32> -> vector<8x512xf32>
    %c0_3 = arith.constant 0 : index
    %c0_4 = arith.constant 0 : index
    %4 = vector.load %arg3[%c0_3, %c0_4] : memref<1x512xf32, #tpu.memory_space<vmem>>, vector<1x512xf32>
    %5 = vector.broadcast %4 : vector<1x512xf32> to vector<8x512xf32>
    %6 = arith.addf %3, %5 : vector<8x512xf32>
    %cst_5 = arith.constant 0.000000e+00 : f32
    %7 = vector.broadcast %cst_5 : f32 to vector<8x512xf32>
    %8 = arith.maximumf %6, %7 : vector<8x512xf32>
    %9 = arith.truncf %8 : vector<8x512xf32> to vector<8x512xbf16>
    %c0_6 = arith.constant 0 : index
    %c0_7 = arith.constant 0 : index
    %10 = vector.load %arg4[%c0_6, %c0_7] : memref<512x128xbf16, #tpu.memory_space<vmem>>, vector<512x128xbf16>
    %cst_8 = arith.constant dense<0.000000e+00> : vector<8x128xf32>
    %11 = tpu.matmul %9, %10, %cst_8 {dimension_numbers = #tpu.dot_dimension_numbers<[1], [0], [0], [1], [0, 0, 1, 1], [], []>} : vector<8x512xbf16>, vector<512x128xbf16>, vector<8x128xf32> -> vector<8x128xf32>
    %c0_9 = arith.constant 0 : index
    %c0_10 = arith.constant 0 : index
    %12 = vector.load %arg5[%c0_9, %c0_10] : memref<1x128xf32, #tpu.memory_space<vmem>>, vector<1x128xf32>
    %13 = vector.broadcast %12 : vector<1x128xf32> to vector<8x128xf32>
    %14 = arith.addf %11, %13 : vector<8x128xf32>
    %cst_11 = arith.constant 0.000000e+00 : f32
    %15 = vector.broadcast %cst_11 : f32 to vector<8x128xf32>
    %16 = arith.maximumf %14, %15 : vector<8x128xf32>
    %c0_12 = arith.constant 0 : index
    %c0_13 = arith.constant 0 : index
    %17 = vector.load %arg6[%c0_12, %c0_13] : memref<8x128xbf16, #tpu.memory_space<vmem>>, vector<8x128xbf16>
    %18 = arith.truncf %16 : vector<8x128xf32> to vector<8x128xbf16>
    %cst_14 = arith.constant dense<0.000000e+00> : vector<8x8xf32>
    %19 = tpu.matmul %17, %18, %cst_14 {dimension_numbers = #tpu.dot_dimension_numbers<[1], [1], [0], [0], [0, 0, 1, 0], [], []>} : vector<8x128xbf16>, vector<8x128xbf16>, vector<8x8xf32> -> vector<8x8xf32>
    %c0_15 = arith.constant 0 : index
    %c0_16 = arith.constant 0 : index
    %20 = memref.load %arg7[%c0_15, %c0_16] : memref<1x1xf32, #tpu.memory_space<smem>>
    %21 = vector.broadcast %20 : f32 to vector<8x8xf32>
    %22 = arith.addf %19, %21 : vector<8x8xf32>
    %23 = arith.negf %22 : vector<8x8xf32>
    %24 = math.exp %23 : vector<8x8xf32>
    %cst_17 = arith.constant 1.000000e+00 : f32
    %25 = vector.broadcast %cst_17 : f32 to vector<8x8xf32>
    %26 = arith.addf %25, %24 : vector<8x8xf32>
    %27 = arith.divf %25, %26 : vector<8x8xf32>
    %c0_18 = arith.constant 0 : index
    %c0_19 = arith.constant 0 : index
    %28 = vector.load %arg8[%c0_18, %c0_19] : memref<8x8xf32, #tpu.memory_space<vmem>>, vector<8x8xf32>
    tpu.vector_store %arg8[%c0_18, %c0_19], %27 {strides = array<i32>} : memref<8x8xf32, #tpu.memory_space<vmem>>, vector<8x8xf32>,
    return
  }
  func.func @transform_0(%arg0: i32) -> (i32, i32) {
    %c0_i32 = arith.constant 0 : i32
    %c0_i32_0 = arith.constant 0 : i32
    return %arg0, %c0_i32 : i32, i32
  }
  func.func @transform_1(%arg0: i32) -> (i32, i32) {
    %c0_i32 = arith.constant 0 : i32
    %c0_i32_0 = arith.constant 0 : i32
    %c0_i32_1 = arith.constant 0 : i32
    return %c0_i32, %c0_i32_0 : i32, i32
  }
  func.func @transform_2(%arg0: i32) -> (i32, i32) {
    %c0_i32 = arith.constant 0 : i32
    %c0_i32_0 = arith.constant 0 : i32
    %c0_i32_1 = arith.constant 0 : i32
    return %c0_i32, %c0_i32_0 : i32, i32
  }
  func.func @transform_3(%arg0: i32) -> (i32, i32) {
    %c0_i32 = arith.constant 0 : i32
    %c0_i32_0 = arith.constant 0 : i32
    %c0_i32_1 = arith.constant 0 : i32
    return %c0_i32, %c0_i32_0 : i32, i32
  }
  func.func @transform_4(%arg0: i32) -> (i32, i32) {
    %c0_i32 = arith.constant 0 : i32
    %c0_i32_0 = arith.constant 0 : i32
    %c0_i32_1 = arith.constant 0 : i32
    return %c0_i32, %c0_i32_0 : i32, i32
  }
  func.func @transform_5(%arg0: i32) -> (i32, i32) {
    %c0_i32 = arith.constant 0 : i32
    %c0_i32_0 = arith.constant 0 : i32
    %c0_i32_1 = arith.constant 0 : i32
    return %c0_i32, %c0_i32_0 : i32, i32
  }
  func.func @transform_6(%arg0: i32) -> (i32, i32) {
    %c0_i32 = arith.constant 0 : i32
    %c0_i32_0 = arith.constant 0 : i32
    %c0_i32_1 = arith.constant 0 : i32
    return %c0_i32, %c0_i32_0 : i32, i32
  }
  func.func @transform_7(%arg0: i32) -> (i32, i32) {
    %c0_i32 = arith.constant 0 : i32
    %c0_i32_0 = arith.constant 0 : i32
    return %c0_i32, %arg0 : i32, i32
  }
}

</mosaic_0001>

<bundles_post_ra>
// kernel: tpu_custom_call.1
= control target key start
LH: loop header
LB: loop body
LE: loop exit
PB: predicated region body
PF: predicated region fallthrough
CT: control target
= control target key end

     0   :  { %13 = vsyncpa [#allocation4], 0  ;;  %s1074_s0 = inlined_call_operand.hbm [shape: f32[8,64], index: 0, kind: input, shape index: {}]   ;;  %s1075_s1 = inlined_call_operand.hbm [shape: bf16[64,512], index: 1, kind: input, shape index: {}]   ;;  %s1076_s2 = inlined_call_operand.vmem [shape: f32[1,512], index: 2, kind: input, shape index: {}]   ;;  %s1077_s3 = inlined_call_operand.hbm [shape: bf16[512,128], index: 3, kind: input, shape index: {}]   ;;  %s1078_s4 = inlined_call_operand.vmem [shape: f32[1,128], index: 4, kind: input, shape index: {}]   ;;  %s1079_s5 = inlined_call_operand.vmem [shape: bf16[8,128], index: 5, kind: input, shape index: {}]   ;;  %s1080_s6 = inlined_call_operand.<no memory space> [shape: f32[1,1], index: 6, kind: input, shape index: {}]   ;;  %s1081_s7 = inlined_call_operand.hbm [shape: f32[8,8], index: 7, kind: output, shape index: {}]  }
   0x1   :  { %14 = vsyncpa [#allocation7], 0 }
   0x2   :  { %15 = vsyncpa [#allocation5], 0  ;;  %s963_s24 = smov [#allocation6]   ;;  %s869_s28 = scalar_lea.hbm %s1075_s1, 2048 }
   0x3   :  { %s31_s25 = sshll.u32 %s963_s24, 4  ;;  %p870_p0 = scmp.ne.s32.totalorder %s1075_s1, %s869_s28  ;;  %s32_s25 = int_to_ptr.vmem [resolvable:$true] %s31_s25 }
   0x4   :  { %p873_p1 = scmp.lt.u32.totalorder %s869_s28, %s1075_s1 }
   0x6   :  { %p875_p2 = pnand %p873_p1, %p870_p0 }
   0x8   :  { %878 = shalt.err (!%p875_p2)
}
   0x9   :  { %s879_s10 = scalar_lea.vmem %s32_s25, 2048  ;;  %p884_p4 = scmp.lt.s32.totalorder %s32_s25, %s32_s25 }
   0xa   :  { %p880_p3 = scmp.ne.s32.totalorder %s32_s25, %s879_s10  ;;  %p885_p5 = scmp.lt.s32.totalorder %s879_s10, %s879_s10 }
   0xc   :  { %p886_p6 = por %p885_p5, %p884_p4 }
   0xe   :  { %p887_p7 = pnand %p886_p6, %p880_p3 }
  0x10   :  { %890 = shalt.err (!%p887_p7)
}
  0x11   :  { %s964_s11 = smov 256   ;;  %s965_s12 = smov 16  }
  0x12   :  { %37 = dma.hbm_to_vmem [thread:$0]  %s1075_s1, 2048, %s32_s25, [#allocation7], %s964_s11, %s964_s11, %s965_s12  }
  0x13   :  { %s966_s15 = smov [#allocation3]   ;;  %s967_s17 = smov [#allocation8]  }
  0x14   :  { %s22_s16 = sshll.u32 %s966_s15, 4  ;;  %s45_s18 = sshll.u32 %s967_s17, 4  ;;  %s23_s16 = int_to_ptr.vmem [resolvable:$true] %s22_s16  ;;  %s46_s18 = int_to_ptr.vmem [resolvable:$true] %s45_s18 }
  0x15   :  { %s891_s21 = scalar_lea.hbm %s1074_s0, 128 }
  0x16   :  { %p892_p8 = scmp.ne.s32.totalorder %s1074_s0, %s891_s21  ;;  %p895_p9 = scmp.lt.u32.totalorder %s891_s21, %s1074_s0 }
  0x18   :  { %p897_p10 = pnand %p895_p9, %p892_p8 }
  0x1a   :  { %900 = shalt.err (!%p897_p10)
}
  0x1b   :  { %s901_s1 = scalar_lea.vmem %s23_s16, 128  ;;  %p906_p12 = scmp.lt.s32.totalorder %s23_s16, %s23_s16 }
  0x1c   :  { %p902_p11 = scmp.ne.s32.totalorder %s23_s16, %s901_s1  ;;  %p907_p13 = scmp.lt.s32.totalorder %s901_s1, %s901_s1 }
  0x1e   :  { %p908_p0 = por %p907_p13, %p906_p12 }
  0x20   :  { %p909_p1 = pnand %p908_p0, %p902_p11 }
  0x22   :  { %912 = shalt.err (!%p909_p1)
}
  0x23   :  { %25 = dma.hbm_to_vmem [thread:$0]  %s1074_s0, 128, %s23_s16, [#allocation4]  }
  0x24   :  { %s913_s30 = scalar_lea.hbm %s1077_s3, 4096 }
  0x25   :  { %p914_p2 = scmp.ne.s32.totalorder %s1077_s3, %s913_s30  ;;  %p917_p3 = scmp.lt.u32.totalorder %s913_s30, %s1077_s3 }
  0x27   :  { %p919_p4 = pnand %p917_p3, %p914_p2 }
  0x29   :  { %922 = shalt.err (!%p919_p4)
}
  0x2a   :  { %s923_s12 = scalar_lea.vmem %s46_s18, 4096  ;;  %p928_p6 = scmp.lt.s32.totalorder %s46_s18, %s46_s18 }
  0x2b   :  { %p924_p5 = scmp.ne.s32.totalorder %s46_s18, %s923_s12  ;;  %p929_p7 = scmp.lt.s32.totalorder %s923_s12, %s923_s12 }
  0x2d   :  { %p930_p8 = por %p929_p7, %p928_p6 }
  0x2f   :  { %p931_p9 = pnand %p930_p8, %p924_p5 }
  0x31   :  { %934 = shalt.err (!%p931_p9)
}
  0x32   :  { %s968_s0 = smov 64   ;;  %s969_s13 = smov 4  }
  0x33   :  { %51 = dma.hbm_to_vmem [thread:$0]  %s1077_s3, 4096, %s46_s18, [#allocation7], %s968_s0, %s968_s0, %s969_s13  }
  0x34   :  { %957 = dma.done.wait [#allocation4], 128  }
  0x35   :  { %958 = vsyncadd [#allocation4], 4294967168 }
  0x36   :  { %959 = dma.done.wait [#allocation7], 6144  }
  0x37   :  { %960 = vsyncadd [#allocation7], 4294961152  ;;  %v970_v0 = vmov 0   ;;  %v809_v1 = vld [vmem:[#allocation6 + $0x4] ss:$16 sps:$4 sm:$0xff]   ;;  %v68_v17 = vld [vmem:[#allocation3] sm:$0xff]  ;;  %v88_v51 = vlaneseq }
  0x38   :  { %224 = vmatprep.mubr.bf16.mxu0 %v970_v0  ;;  %265 = vmatprep.mubr.bf16.mxu1 %v970_v0  ;;  %v811_v2 = vld [vmem:[#allocation6 + $0xc] ss:$16 sps:$4 sm:$0xff]   ;;  %v813_v3 = vld [vmem:[#allocation6] ss:$16 sps:$4 sm:$0xff]   ;;  %v814_v4 = vld [vmem:[#allocation6 + $0x8] ss:$16 sps:$4 sm:$0xff]   ;;  %v69_v21 = vpack.c.bf16 %v68_v17, %v68_v17 }
  0x39   :  { %192 = vmatprep.subr.bf16.mxu0 %v809_v1  ;;  %233 = vmatprep.subr.bf16.mxu1 %v811_v2  ;;  %v815_v5 = vld [vmem:[#allocation6 + $0x24] ss:$16 sps:$4 sm:$0xff]   ;;  %v817_v6 = vld [vmem:[#allocation6 + $0x2c] ss:$16 sps:$4 sm:$0xff]   ;;  %v819_v7 = vld [vmem:[#allocation6 + $0x20] ss:$16 sps:$4 sm:$0xff]  }
  0x3a   :  { %193 = vmatpush1.bf16.msra.mxu0 %v813_v3  ;;  %234 = vmatpush1.bf16.msra.mxu1 %v814_v4  ;;  %v820_v8 = vld [vmem:[#allocation6 + $0x28] ss:$16 sps:$4 sm:$0xff]   ;;  %v821_v9 = vld [vmem:[#allocation6 + $0x44] ss:$16 sps:$4 sm:$0xff]   ;;  %v823_v10 = vld [vmem:[#allocation6 + $0x4c] ss:$16 sps:$4 sm:$0xff]  }
  0x3b   :  { %194 = vmatprep.subr.bf16.mxu0 %v815_v5  ;;  %235 = vmatprep.subr.bf16.mxu1 %v817_v6  ;;  %v825_v11 = vld [vmem:[#allocation6 + $0x40] ss:$16 sps:$4 sm:$0xff]   ;;  %v826_v12 = vld [vmem:[#allocation6 + $0x48] ss:$16 sps:$4 sm:$0xff]   ;;  %v827_v13 = vld [vmem:[#allocation6 + $0x64] ss:$16 sps:$4 sm:$0xff]  }
  0x3c   :  { %v829_v14 = vld [vmem:[#allocation6 + $0x6c] ss:$16 sps:$4 sm:$0xff]   ;;  %v831_v15 = vld [vmem:[#allocation6 + $0x60] ss:$16 sps:$4 sm:$0xff]   ;;  %v832_v16 = vld [vmem:[#allocation6 + $0x68] ss:$16 sps:$4 sm:$0xff]  }
  0x3d   :  { %v833_v18 = vld [vmem:[#allocation8 + $0x40] sm:$0xff]   ;;  %vm188_vm0 = vcmask 523264   ;;  %v837_v23 = vld [vmem:[#allocation8 + $0x48] sm:$0xff]   ;;  %v841_v27 = vld [vmem:[#allocation8 + $0x50] sm:$0xff]   ;;  %v89_v52 = vshrl.u32 %v88_v51, 7  ;;  %vm972_vm1 = vmmov 0  }
  0x3e   :  { %195 = vmatpush1.bf16.msra.mxu0 %v819_v7  ;;  %236 = vmatpush1.bf16.msra.mxu1 %v820_v8  ;;  %v834_v19 = vld [vmem:[#allocation8 + $0xc0] sm:$0xff]   ;;  %v838_v24 = vld [vmem:[#allocation8 + $0xc8] sm:$0xff]   ;;  %v842_v28 = vld [vmem:[#allocation8 + $0xd0] sm:$0xff]   ;;  %s973_s21 = smov [#allocation9]   ;;  %vm676_vm2 = vcmask 64512  }
  0x3f   :  { %196 = vmatprep.subr.bf16.mxu0 %v821_v9  ;;  %237 = vmatprep.subr.bf16.mxu1 %v823_v10  ;;  %v835_v20 = vld [vmem:[#allocation8] sm:$0xff]   ;;  %v839_v25 = vld [vmem:[#allocation8 + $0x8] sm:$0xff]   ;;  %v843_v29 = vld [vmem:[#allocation8 + $0x10] sm:$0xff]   ;;  %v90_v53 = vsub.s32 0, %v89_v52  ;;  %v98_v54 = vsub.s32 2, %v89_v52  ;;  %v94_v56 = vsub.s32 1, %v89_v52 }
  0x40   :  { %v836_v22 = vld [vmem:[#allocation8 + $0x80] sm:$0xff]   ;;  %v840_v26 = vld [vmem:[#allocation8 + $0x88] sm:$0xff]   ;;  %v844_v30 = vld [vmem:[#allocation8 + $0x90] sm:$0xff]   ;;  %v102_v57 = vsub.s32 3, %v89_v52  ;;  %s684_s22 = sshll.u32 %s973_s21, 4  ;;  %s685_s22 = int_to_ptr.vmem [resolvable:$true] %s684_s22 }
  0x41   :  { %v845_v31 = vld [vmem:[#allocation8 + $0x58] sm:$0xff]   ;;  %v849_v35 = vld [vmem:[#allocation8 + $0x60] sm:$0xff]   ;;  %v853_v39 = vld [vmem:[#allocation8 + $0x68] sm:$0xff]   ;;  %p940_p11 = scmp.lt.s32.totalorder %s685_s22, %s685_s22 }
  0x42   :  { %197 = vmatpush1.bf16.msra.mxu0 %v825_v11  ;;  %238 = vmatpush1.bf16.msra.mxu1 %v826_v12  ;;  %v846_v32 = vld [vmem:[#allocation8 + $0xd8] sm:$0xff]   ;;  %v850_v36 = vld [vmem:[#allocation8 + $0xe0] sm:$0xff]   ;;  %v854_v40 = vld [vmem:[#allocation8 + $0xe8] sm:$0xff]  }
  0x43   :  { %198 = vmatprep.subr.bf16.mxu0 %v827_v13  ;;  %239 = vmatprep.subr.bf16.mxu1 %v829_v14  ;;  %v847_v33 = vld [vmem:[#allocation8 + $0x18] sm:$0xff]   ;;  %v851_v37 = vld [vmem:[#allocation8 + $0x20] sm:$0xff]   ;;  %v855_v41 = vld [vmem:[#allocation8 + $0x28] sm:$0xff]  }
  0x44   :  { %v848_v34 = vld [vmem:[#allocation8 + $0x98] sm:$0xff]   ;;  %v852_v38 = vld [vmem:[#allocation8 + $0xa0] sm:$0xff]   ;;  %v856_v42 = vld [vmem:[#allocation8 + $0xa8] sm:$0xff]  }
  0x45   :  { %v857_v43 = vld [vmem:[#allocation8 + $0x70] sm:$0xff]   ;;  %v861_v47 = vld [vmem:[#allocation8 + $0x78] sm:$0xff]  }
  0x46   :  { %199 = vmatpush1.bf16.msra.mxu0 %v831_v15  ;;  %240 = vmatpush1.bf16.msra.mxu1 %v832_v16  ;;  %v858_v44 = vld [vmem:[#allocation8 + $0xf0] sm:$0xff]   ;;  %v862_v48 = vld [vmem:[#allocation8 + $0xf8] sm:$0xff]  }
  0x47   :  { %746 = vmatprep.subr.bf16.mxu0 %v833_v18  ;;  %768 = vmatprep.subr.bf16.mxu1 %v834_v19  ;;  %v859_v45 = vld [vmem:[#allocation8 + $0x30] sm:$0xff]   ;;  %v863_v49 = vld [vmem:[#allocation8 + $0x38] sm:$0xff]   ;;  %v971_v18 = vmov 0.0  }
  0x48   :  { %v860_v46 = vld [vmem:[#allocation8 + $0xb0] sm:$0xff]   ;;  %v864_v50 = vld [vmem:[#allocation8 + $0xb8] sm:$0xff]  }
  0x49   :  { %710 = vmatmul.mubr.msk.bf16.vlgmr.msra.gmra.mrb[0].mxu0 %vm188_vm0, %v69_v21  ;;  %711 = vmatmul.mubr.msk.bf16.vlgmr.msra.gmra.mrb[0].mxu1 %vm188_vm0, %v69_v21  ;;  %v86_v55 = vld [vmem:[%s1076_s2] sm:$0xf] }
  0x4a   :  { %747 = vmatpush3.bf16.msra.mxu0 %v835_v20  ;;  %769 = vmatpush3.bf16.msra.mxu1 %v836_v22  ;;  %v91_v58 = vrot.slane %v86_v55, %v90_v53  ;;  %v99_v59 = vrot.slane %v86_v55, %v98_v54  ;;  %v95_v60 = vrot.slane %v86_v55, %v94_v56  ;;  %v712_v21 = vld [vmem:[%s1078_s4] ss:$0 sm:$0xff] }
  0x4b   :  { %748 = vmatprep.subr.bf16.mxu0 %v837_v23  ;;  %770 = vmatprep.subr.bf16.mxu1 %v838_v24  ;;  %v103_v61 = vrot.slane %v86_v55, %v102_v57 }
  0x4e   :  { %749 = vmatpush3.bf16.msra.mxu0 %v839_v25  ;;  %771 = vmatpush3.bf16.msra.mxu1 %v840_v26 }
  0x4f   :  { %750 = vmatprep.subr.bf16.mxu0 %v841_v27  ;;  %772 = vmatprep.subr.bf16.mxu1 %v842_v28 }
  0x52   :  { %751 = vmatpush3.bf16.msra.mxu0 %v843_v29  ;;  %773 = vmatpush3.bf16.msra.mxu1 %v844_v30 }
  0x53   :  { %752 = vmatprep.subr.bf16.mxu0 %v845_v31  ;;  %774 = vmatprep.subr.bf16.mxu1 %v846_v32 }
  0x56   :  { %753 = vmatpush3.bf16.msra.mxu0 %v847_v33  ;;  %775 = vmatpush3.bf16.msra.mxu1 %v848_v34  ;;  %v626_v34 = vld [vmem:[%s1079_s5] sm:$0xf]  ;;  %s935_s5 = scalar_lea.vmem %s685_s22, 128 }
  0x57   :  { %754 = vmatprep.subr.bf16.mxu0 %v849_v35  ;;  %776 = vmatprep.subr.bf16.mxu1 %v850_v36  ;;  %v629_v35 = vstv %s1080_s6  ;;  %p936_p10 = scmp.ne.s32.totalorder %s685_s22, %s935_s5  ;;  %p941_p12 = scmp.lt.s32.totalorder %s935_s5, %s935_s5 }
  0x59   :  { %p942_p13 = por %p941_p12, %p940_p11 }
  0x5a   :  { %755 = vmatpush3.bf16.msra.mxu0 %v851_v37  ;;  %777 = vmatpush3.bf16.msra.mxu1 %v852_v38 }
  0x5b   :  { %756 = vmatprep.subr.bf16.mxu0 %v853_v39  ;;  %778 = vmatprep.subr.bf16.mxu1 %v854_v40  ;;  %p943_p0 = pnand %p942_p13, %p936_p10 }
  0x5e   :  { %757 = vmatpush3.bf16.msra.mxu0 %v855_v41  ;;  %779 = vmatpush3.bf16.msra.mxu1 %v856_v42 }
  0x5f   :  { %758 = vmatprep.subr.bf16.mxu0 %v857_v43  ;;  %780 = vmatprep.subr.bf16.mxu1 %v858_v44 }
  0x62   :  { %759 = vmatpush3.bf16.msra.mxu0 %v859_v45  ;;  %781 = vmatpush3.bf16.msra.mxu1 %v860_v46 }
  0x63   :  { %760 = vmatprep.subr.bf16.mxu0 %v861_v47  ;;  %782 = vmatprep.subr.bf16.mxu1 %v862_v48 }
  0x66   :  { %761 = vmatpush3.bf16.msra.mxu0 %v863_v49  ;;  %783 = vmatpush3.bf16.msra.mxu1 %v864_v50 }
  0x67   :  { %792 = vmatprep.subr.bf16.mxu0 %v971_v18 }
 0x11c   :  { %v226_v62 = vpop.f32.mrb[0].mxu0  ;;  %v267_v63 = vpop.f32.mrb[0].mxu1 }
 0x11d   :  { %v227_v0 = vadd.f32 %v226_v62, %v91_v58  ;;  %v268_v1 = vadd.f32 %v267_v63, %v99_v59  ;;  %v228_v2 = vpop.f32.mrb[1].mxu0  ;;  %v269_v3 = vpop.f32.mrb[1].mxu1 }
 0x11e   :  { %v229_v4 = vadd.f32 %v228_v2, %v95_v60  ;;  %v270_v5 = vadd.f32 %v269_v3, %v103_v61  ;;  %v230_v6 = vpop.f32.mrb[2].mxu0  ;;  %v271_v7 = vpop.f32.mrb[2].mxu1 }
 0x11f   :  { %v274_v8 = vmax.f32 %v227_v0, 0.0  ;;  %v276_v9 = vmax.f32 %v268_v1, 0.0  ;;  %v231_v10 = vpop.f32.mrb[3].mxu0  ;;  %v272_v11 = vpop.f32.mrb[3].mxu1 }
 0x120   :  { %v275_v12 = vmax.f32 %v229_v4, 0.0  ;;  %v277_v13 = vmax.f32 %v270_v5, 0.0 }
 0x121   :  { %v280_v14 = vpack.c.bf16 %v276_v9, %v276_v9  ;;  %v278_v17 = vpack.c.bf16 %v274_v8, %v274_v8 }
 0x122   :  { %v279_v15 = vpack.c.bf16 %v275_v12, %v275_v12  ;;  %v281_v16 = vpack.c.bf16 %v277_v13, %v277_v13 }
 0x124   :  { %577 = vmatprep.mubr.bf16.mxu0 %v279_v15  ;;  %617 = vmatprep.mubr.bf16.mxu1 %v281_v16 }
 0x125   :  { %578 = vmatmul.mubr.bf16.vlgmr.msra.gmra.mrb[4].mxu0 %v278_v17  ;;  %618 = vmatmul.mubr.bf16.vlgmr.msra.gmra.mrb[4].mxu1 %v280_v14 }
 0x126   :  { %794 = vmatprep.mubr.msk.bf16.mxu0 %vm972_vm1, %v971_v18 }
 0x1f8   :  { %v762_v19 = vpop.f32.mrb[4].mxu0  ;;  %v784_v20 = vpop.f32.mrb[4].mxu1 }
 0x1f9   :  { %v763_v22 = vpop.f32.mrb[5].mxu0  ;;  %v785_v23 = vpop.f32.mrb[5].mxu1 }
 0x1fa   :  { %v764_v24 = vadd.f32 %v763_v22, %v762_v19  ;;  %v786_v25 = vadd.f32 %v785_v23, %v784_v20  ;;  %v765_v26 = vpop.f32.mrb[6].mxu0  ;;  %v787_v27 = vpop.f32.mrb[6].mxu1 }
 0x1fb   :  { %v766_v28 = vpop.f32.mrb[7].mxu0  ;;  %v788_v29 = vpop.f32.mrb[7].mxu1 }
 0x1fc   :  { %v580_v30 = vadd.f32 %v764_v24, %v712_v21 }
 0x1fe   :  { %v620_v31 = vadd.f32 %v786_v25, %v580_v30 }
 0x200   :  { %v625_v32 = vmax.f32 %v620_v31, 0.0 }
 0x202   :  { %v627_v33 = vpack.c.bf16 %v625_v32, %v625_v32 }
 0x204   :  { %793 = vmatpush3.bf16.xpose.msra.mxu0 %v627_v33 }
 0x20b   :  { %795 = vmatmul.mubr.bf16.vlgmr.msra.gmra.mrb[8].mxu0 %v626_v34 }
 0x2de   :  { %v664_v36 = vpop.f32.mrb[8].mxu0 }
 0x2df   :  { %v665_v37 = vadd.f32 %v664_v36, %v629_v35  ;;  %v796_v38 = vpop.f32.mrb[9].mxu0 }
 0x2e0   :  { %v667_v39 = vpop.f32.mrb[10].mxu0 }
 0x2e1   :  { %v745_v40 = vmul.f32 -1.442695, %v665_v37  ;;  %v797_v41 = vpop.f32.mrb[11].mxu0 }
 0x2e3   :  { %865 = vpow2.f32 %v745_v40 }
 0x2ed   :  { %v866_v42 = vpop.eup %865 }
 0x2ee   :  { %v673_v43 = vadd.f32 1.0, %v866_v42 }
 0x2f0   :  { %867 = vrcp.f32 %v673_v43 }
 0x2fa   :  { %v868_v44 = vpop.eup %867 }
 0x2fb   :  { %677 = vst.msk [vmem:[#allocation9] sm:$0xff] %vm676_vm2, %v868_v44 }
 0x2fc   :  { %946 = shalt.err (!%p943_p0)
}
 0x2fd   :  { %s947_s24 = scalar_lea.hbm %s1081_s7, 128 }
 0x2fe   :  { %p948_p1 = scmp.ne.s32.totalorder %s1081_s7, %s947_s24  ;;  %p951_p2 = scmp.lt.u32.totalorder %s947_s24, %s1081_s7 }
 0x300   :  { %p953_p3 = pnand %p951_p2, %p948_p1 }
 0x302   :  { %956 = shalt.err (!%p953_p3)
}
 0x303   :  { %687 = dma.vmem_to_hbm [thread:$0]  %s685_s22, 128, %s1081_s7, [#allocation5]  }
 0x304   :  { %961 = dma.done.wait [#allocation5], 128  }
 0x305   :  { %962 = vsyncadd [#allocation5], 4294967168 }
 0x306   :  { %691 = vsyncpa [#allocation4], 1 }
 0x307   :  { %692 = vsyncpa [#allocation7], 1 }
 0x308   :  { %693 = vsyncpa [#allocation5], 1 }

</bundles_post_ra>
